<compile_context>
chip_gen: v5e
topology: v5e:2x2
jax: 0.10.0
libtpu: 0.0.40
codegen_flags: <defaults>
</compile_context>

<pallas_src>
import functools

import numpy as np
import jax
import jax.numpy as jnp
from jax.experimental import pallas as pl
from jax.experimental.pallas import tpu as pltpu

# SSD default prior-box variances (cfg.VARIANCE)
VARIANCE = (0.1, 0.2)

_LANE = 128
_DEFAULT_TILE_P = 1024  # lanes of priors per grid step (multiple of 128)


def _round_up(x, m):
    return (x + m - 1) // m * m


def _postproc_kernel(loc_ref, conf_ref, prior_ref, box_ref, conf_out_ref):
    """One (batch, prior-tile) block.

    loc_ref      : (1, TP, 4)    location predictions (native layout, any float)
    conf_ref     : (1, TP, C)    class logits
    prior_ref    : (TP, 4)       prior boxes (cx, cy, w, h)
    box_ref      : (1, 4, TP)    decoded boxes (xmin, ymin, xmax, ymax), lane-dense
    conf_out_ref : (1, C-1, TP)  softmax scores of foreground classes, lane-dense
    """
    # Swap to a lane-dense [channels, priors] layout in-kernel (XLU slot is
    # otherwise idle) and cast to f32 in-kernel so bf16 inputs never pay a
    # separate wrapper-side XLA transpose/cast pass over HBM.
    loc = jnp.transpose(loc_ref[0].astype(jnp.float32), (1, 0))          # (4, TP)
    priors = jnp.transpose(prior_ref[...].astype(jnp.float32), (1, 0))   # (4, TP)
    logits = jnp.transpose(conf_ref[0].astype(jnp.float32), (1, 0))      # (C, TP)

    # Softmax over classes (sublane axis).  Normalize with the EUP reciprocal
    # (plus one Newton step on the tiny (1, TP) vector, essentially free)
    # instead of a C-row VALU divide.
    m = jnp.max(logits, axis=0, keepdims=True)
    e = jnp.exp(logits - m)
    s = jnp.sum(e, axis=0, keepdims=True)
    inv = pl.reciprocal(s, approx=True)
    inv = inv * (2.0 - s * inv)          # Newton refinement -> full f32 accuracy
    # Background (class 0) is never consumed downstream -> emit classes 1..C-1
    # only, so jax.lax.top_k reads this output with no intermediate slice copy.
    conf_out_ref[0] = (e[1:, :] * inv).astype(conf_out_ref.dtype)

    # decode(loc, priors, variances) in the lane-dense layout; single (4, TP)
    # store per tile (tail-block copy-out is clamped by the pipeline).
    cxy = priors[0:2, :] + loc[0:2, :] * VARIANCE[0] * priors[2:4, :]
    wh = priors[2:4, :] * jnp.exp(loc[2:4, :] * VARIANCE[1])
    xy_min = cxy - wh * 0.5
    xy_max = xy_min + wh
    box_ref[0] = jnp.concatenate([xy_min, xy_max], axis=0).astype(box_ref.dtype)


def decode_and_softmax(loc_data, conf_data, prior_data, *, tile_p=None):
    """loc [B,P,4], conf [B,P,C], prior [P,4] ->
       boxes_t [B,4,P], conf_fg [B,C-1,P]  (float32, lane-dense on priors).

    The prior axis is tiled with a ceiling-divided grid; the partial tail
    block's copies are clamped by Pallas, so inputs never need a wrapper-side
    pad pass and outputs keep their exact (unpadded) shapes."""
    B, P, _ = loc_data.shape
    C = conf_data.shape[-1]

    if tile_p is None:
        tile_p = min(_DEFAULT_TILE_P, _round_up(P, _LANE))
    assert tile_p % _LANE == 0, "prior tile must be a multiple of 128 lanes"
    grid_p = pl.cdiv(P, tile_p)

    boxes_t, conf_fg = pl.pallas_call(
        _postproc_kernel,
        out_shape=(
            jax.ShapeDtypeStruct((B, 4, P), jnp.float32),
            jax.ShapeDtypeStruct((B, C - 1, P), jnp.float32),
        ),
        grid_spec=pltpu.PrefetchScalarGridSpec(
            num_scalar_prefetch=0,
            grid=(B, grid_p),
            in_specs=[
                pl.BlockSpec((1, tile_p, 4), lambda b, p: (b, p, 0)),
                pl.BlockSpec((1, tile_p, C), lambda b, p: (b, p, 0)),
                pl.BlockSpec((tile_p, 4), lambda b, p: (p, 0)),
            ],
            out_specs=[
                pl.BlockSpec((1, 4, tile_p), lambda b, p: (b, 0, p)),
                pl.BlockSpec((1, C - 1, tile_p), lambda b, p: (b, 0, p)),
            ],
        ),
        compiler_params=pltpu.CompilerParams(
            # Both axes are independent -> megacore shards even when B == 1.
            dimension_semantics=("parallel", "parallel"),
            # Tiles are a few MiB double-buffered; keep the scoped limit
            # explicit so v7x (64 MiB physical) never overshoots.
            vmem_limit_bytes=32 * 1024 * 1024,
        ),
    )(loc_data, conf_data, prior_data)

    return boxes_t, conf_fg


@functools.partial(jax.jit, static_argnames=("k", "tile_p"))
def _dense_device_pass(loc_data, conf_data, prior_data, *, k, tile_p=None):
    """Kernel + device-side per-class top-k pre-selection, so only
    O(B*(C-1)*k) scores/boxes ever cross PCIe for the host NMS."""
    boxes_t, conf_fg = decode_and_softmax(
        loc_data, conf_data, prior_data, tile_p=tile_p)
    scores, idx = jax.lax.top_k(conf_fg, k)                       # [B, C-1, k]
    boxes_sel = jax.vmap(lambda bt, ib: bt[:, ib])(boxes_t, idx)  # [B, 4, C-1, k]
    boxes_sel = jnp.transpose(boxes_sel, (0, 2, 3, 1))            # [B, C-1, k, 4]
    return scores, boxes_sel


# ----------------------- host-side glue (greedy NMS) -----------------------
# TODO(synk): greedy NMS has data-dependent, dynamic-length outputs (a Python
# list of variable-size detections); no clean fixed-shape Pallas equivalent,
# so it runs in numpy on the small device-pre-selected candidate set.
def _nms_topk_numpy(boxes, scores, overlap, top_k):
    x1, y1, x2, y2 = boxes[:, 0], boxes[:, 1], boxes[:, 2], boxes[:, 3]
    areas = (x2 - x1) * (y2 - y1)
    order = scores.argsort()[::-1]
    keep = []
    while order.size > 0:
        i = order[0]
        keep.append(i)
        rest = order[1:]
        xx1 = np.maximum(x1[i], x1[rest])
        yy1 = np.maximum(y1[i], y1[rest])
        xx2 = np.minimum(x2[i], x2[rest])
        yy2 = np.minimum(y2[i], y2[rest])
        w = np.maximum(0.0, xx2 - xx1)
        h = np.maximum(0.0, yy2 - yy1)
        inter = w * h
        iou = inter / (areas[i] + areas[rest] - inter + 1e-12)
        order = rest[iou <= overlap]
    keep = np.asarray(keep, dtype=np.int64)
    return keep[: min(keep.shape[0], top_k)]


class Postprocessor:
    def __init__(self, num_classes, top_k, conf_thresh, nms_thresh):
        if nms_thresh <= 0:
            raise ValueError("nms_threshold must be non negative.")
        self.num_classes = num_classes
        self.background_label = 0
        self.top_k = top_k
        self.nms_thresh = nms_thresh
        self.conf_thresh = conf_thresh
        self.variance = VARIANCE

    def __call__(self, loc_data, conf_data, prior_data):
        B, P, _ = loc_data.shape
        k = min(self.top_k, P)
        scores, boxes = _dense_device_pass(loc_data, conf_data, prior_data, k=k)
        # Only the per-class top-k candidates are transferred device -> host.
        scores_np = np.asarray(jax.device_get(scores))   # [B, C-1, k]
        boxes_np = np.asarray(jax.device_get(boxes))     # [B, C-1, k, 4]

        # NOTE: NMS over the per-class top-k highest-scoring candidates matches
        # NMS over all above-threshold candidates except in the rare tail case
        # where fewer than top_k of them survive suppression.
        output = []
        for b in range(scores_np.shape[0]):
            for ci in range(self.num_classes - 1):        # row ci == class ci+1
                s = scores_np[b, ci]
                mask = s > self.conf_thresh
                if not np.any(mask):
                    continue
                sm = s[mask]
                bm = boxes_np[b, ci][mask].reshape(-1, 4)
                ids = _nms_topk_numpy(bm, sm, self.nms_thresh, self.top_k)
                output.append(
                    np.concatenate([sm[ids][:, None], bm[ids]], axis=1))
        return output


if __name__ == "__main__":
    key = jax.random.PRNGKey(0)
    B, P, C = 2, 300, 8  # batch, num_priors (deliberately not 128-aligned), classes

    k1, k2, k3, k4 = jax.random.split(key, 4)
    loc_data = jax.random.normal(k1, (B, P, 4), dtype=jnp.float32) * 0.5
    conf_data = jax.random.normal(k2, (B, P, C), dtype=jnp.float32)
    prior_cxy = jax.random.uniform(k3, (P, 2), minval=0.05, maxval=0.95)
    prior_wh = jax.random.uniform(k4, (P, 2), minval=0.05, maxval=0.3)
    prior_data = jnp.concatenate([prior_cxy, prior_wh], axis=1)  # [P, 4]

    # Pure-JAX reference (torch semantics).
    conf_ref_t = jnp.transpose(jax.nn.softmax(conf_data, axis=2), (0, 2, 1))  # [B,C,P]
    conf_ref_fg = conf_ref_t[:, 1:, :]                                        # [B,C-1,P]
    pr = jnp.broadcast_to(prior_data[None], (B, P, 4)).reshape(-1, 4)
    lc = loc_data.reshape(-1, 4)
    cxy = pr[:, :2] + lc[:, :2] * VARIANCE[0] * pr[:, 2:]
    wh = pr[:, 2:] * jnp.exp(lc[:, 2:] * VARIANCE[1])
    xy_min = cxy - wh / 2
    xy_max = xy_min + wh
    boxes_ref_t = jnp.transpose(
        jnp.concatenate([xy_min, xy_max], axis=1).reshape(B, P, 4), (0, 2, 1))  # [B,4,P]

    # Run the Pallas kernel: default (single-tile) and explicit multi-tile config
    # (the latter exercises the clamped partial tail block).
    for tp in (None, 128):
        boxes_t, conf_fg = decode_and_softmax(
            loc_data, conf_data, prior_data, tile_p=tp)
        jax.block_until_ready((boxes_t, conf_fg))
        assert boxes_t.shape == (B, 4, P) and conf_fg.shape == (B, C - 1, P)
        np.testing.assert_allclose(np.asarray(boxes_t), np.asarray(boxes_ref_t),
                                   atol=1e-4, rtol=1e-4)
        np.testing.assert_allclose(np.asarray(conf_fg), np.asarray(conf_ref_fg),
                                   atol=1e-4, rtol=1e-4)

    # Full forward (kernel + device-side top-k + host-side NMS glue).
    post = Postprocessor(num_classes=C, top_k=200, conf_thresh=0.01, nms_thresh=0.5)
    detections = post(loc_data, conf_data, prior_data)
    assert len(detections) > 0 and all(d.shape[1] == 5 for d in detections)

    print("KERNEL_OK")
</pallas_src>

<mosaic_0001>
module attributes {stable_mosaic.version = 11 : i64} {
  func.func @_postproc_kernel(%arg0: i32, %arg1: i32, %arg2: memref<1x384x4xf32, #tpu.memory_space<vmem>>, %arg3: memref<1x384x8xf32, #tpu.memory_space<vmem>>, %arg4: memref<384x4xf32, #tpu.memory_space<vmem>>, %arg5: memref<1x4x384xf32, #tpu.memory_space<vmem>>, %arg6: memref<1x7x384xf32, #tpu.memory_space<vmem>>) attributes {dimension_semantics = [#tpu.dimension_semantics<parallel>, #tpu.dimension_semantics<parallel>], iteration_bounds = array<i64: 2, 1>, scalar_prefetch = 0 : i64, scratch_operands = 0 : i64, tpu.core_type = #tpu.core_type<tc>, window_params = [{transform_indices = @transform_0, window_bounds = array<i64: 1, 384, 4>}, {transform_indices = @transform_1, window_bounds = array<i64: 1, 384, 8>}, {transform_indices = @transform_2, window_bounds = array<i64: 384, 4>}, {transform_indices = @transform_3, window_bounds = array<i64: 1, 4, 384>}, {transform_indices = @transform_4, window_bounds = array<i64: 1, 7, 384>}]} {
    %c0 = arith.constant 0 : index
    %c0_0 = arith.constant 0 : index
    %c0_1 = arith.constant 0 : index
    %0 = vector.load %arg2[%c0, %c0_0, %c0_1] : memref<1x384x4xf32, #tpu.memory_space<vmem>>, vector<1x384x4xf32>
    %1 = vector.shape_cast %0 : vector<1x384x4xf32> to vector<384x4xf32>
    %2 = tpu.transpose %1, [1, 0] : vector<384x4xf32> -> vector<4x384xf32>
    %c0_2 = arith.constant 0 : index
    %c0_3 = arith.constant 0 : index
    %3 = vector.load %arg4[%c0_2, %c0_3] : memref<384x4xf32, #tpu.memory_space<vmem>>, vector<384x4xf32>
    %4 = tpu.transpose %3, [1, 0] : vector<384x4xf32> -> vector<4x384xf32>
    %c0_4 = arith.constant 0 : index
    %c0_5 = arith.constant 0 : index
    %c0_6 = arith.constant 0 : index
    %5 = vector.load %arg3[%c0_4, %c0_5, %c0_6] : memref<1x384x8xf32, #tpu.memory_space<vmem>>, vector<1x384x8xf32>
    %6 = vector.shape_cast %5 : vector<1x384x8xf32> to vector<384x8xf32>
    %7 = tpu.transpose %6, [1, 0] : vector<384x8xf32> -> vector<8x384xf32>
    %cst = arith.constant dense<0xFF800000> : vector<384xf32>
    %8 = vector.multi_reduction <maximumf>, %7, %cst [0] : vector<8x384xf32> to vector<384xf32>
    %9 = vector.shape_cast %8 : vector<384xf32> to vector<1x384xf32>
    %10 = vector.broadcast %9 : vector<1x384xf32> to vector<8x384xf32>
    %11 = arith.subf %7, %10 : vector<8x384xf32>
    %12 = math.exp %11 : vector<8x384xf32>
    %cst_7 = arith.constant dense<0.000000e+00> : vector<384xf32>
    %13 = vector.multi_reduction <add>, %12, %cst_7 [0] : vector<8x384xf32> to vector<384xf32>
    %14 = vector.shape_cast %13 : vector<384xf32> to vector<1x384xf32>
    %15 = tpu.reciprocal %14 {approx = true} : vector<1x384xf32> -> vector<1x384xf32>
    %16 = arith.mulf %14, %15 : vector<1x384xf32>
    %cst_8 = arith.constant 2.000000e+00 : f32
    %17 = vector.broadcast %cst_8 : f32 to vector<1x384xf32>
    %18 = arith.subf %17, %16 : vector<1x384xf32>
    %19 = arith.mulf %15, %18 : vector<1x384xf32>
    %20 = vector.extract_strided_slice %12 {offsets = [1, 0], sizes = [7, 384], strides = [1, 1]} : vector<8x384xf32> to vector<7x384xf32>
    %21 = vector.broadcast %19 : vector<1x384xf32> to vector<7x384xf32>
    %22 = arith.mulf %20, %21 : vector<7x384xf32>
    %c0_9 = arith.constant 0 : index
    %c0_10 = arith.constant 0 : index
    %c0_11 = arith.constant 0 : index
    %23 = vector.load %arg6[%c0_9, %c0_10, %c0_11] : memref<1x7x384xf32, #tpu.memory_space<vmem>>, vector<1x7x384xf32>
    %24 = vector.shape_cast %23 : vector<1x7x384xf32> to vector<7x384xf32>
    %25 = vector.shape_cast %22 : vector<7x384xf32> to vector<1x7x384xf32>
    tpu.vector_store %arg6[%c0_9, %c0_10, %c0_11], %25 {strides = array<i32>} : memref<1x7x384xf32, #tpu.memory_space<vmem>>, vector<1x7x384xf32>,
    %26 = vector.extract_strided_slice %4 {offsets = [0, 0], sizes = [2, 384], strides = [1, 1]} : vector<4x384xf32> to vector<2x384xf32>
    %27 = vector.extract_strided_slice %2 {offsets = [0, 0], sizes = [2, 384], strides = [1, 1]} : vector<4x384xf32> to vector<2x384xf32>
    %cst_12 = arith.constant 1.000000e-01 : f32
    %28 = vector.broadcast %cst_12 : f32 to vector<2x384xf32>
    %29 = arith.mulf %27, %28 : vector<2x384xf32>
    %30 = vector.extract_strided_slice %4 {offsets = [2, 0], sizes = [2, 384], strides = [1, 1]} : vector<4x384xf32> to vector<2x384xf32>
    %31 = arith.mulf %29, %30 : vector<2x384xf32>
    %32 = arith.addf %26, %31 : vector<2x384xf32>
    %33 = vector.extract_strided_slice %4 {offsets = [2, 0], sizes = [2, 384], strides = [1, 1]} : vector<4x384xf32> to vector<2x384xf32>
    %34 = vector.extract_strided_slice %2 {offsets = [2, 0], sizes = [2, 384], strides = [1, 1]} : vector<4x384xf32> to vector<2x384xf32>
    %cst_13 = arith.constant 2.000000e-01 : f32
    %35 = vector.broadcast %cst_13 : f32 to vector<2x384xf32>
    %36 = arith.mulf %34, %35 : vector<2x384xf32>
    %37 = math.exp %36 : vector<2x384xf32>
    %38 = arith.mulf %33, %37 : vector<2x384xf32>
    %cst_14 = arith.constant 5.000000e-01 : f32
    %39 = vector.broadcast %cst_14 : f32 to vector<2x384xf32>
    %40 = arith.mulf %38, %39 : vector<2x384xf32>
    %41 = arith.subf %32, %40 : vector<2x384xf32>
    %42 = arith.addf %41, %38 : vector<2x384xf32>
    %43 = tpu.concatenate %41, %42 in 0 : vector<2x384xf32>, vector<2x384xf32> -> vector<4x384xf32>
    %c0_15 = arith.constant 0 : index
    %c0_16 = arith.constant 0 : index
    %c0_17 = arith.constant 0 : index
    %44 = vector.load %arg5[%c0_15, %c0_16, %c0_17] : memref<1x4x384xf32, #tpu.memory_space<vmem>>, vector<1x4x384xf32>
    %45 = vector.shape_cast %44 : vector<1x4x384xf32> to vector<4x384xf32>
    %46 = vector.shape_cast %43 : vector<4x384xf32> to vector<1x4x384xf32>
    tpu.vector_store %arg5[%c0_15, %c0_16, %c0_17], %46 {strides = array<i32>} : memref<1x4x384xf32, #tpu.memory_space<vmem>>, vector<1x4x384xf32>,
    return
  }
  func.func @transform_0(%arg0: i32, %arg1: i32) -> (i32, i32, i32) {
    %c0_i32 = arith.constant 0 : i32
    %c0_i32_0 = arith.constant 0 : i32
    return %arg0, %arg1, %c0_i32 : i32, i32, i32
  }
  func.func @transform_1(%arg0: i32, %arg1: i32) -> (i32, i32, i32) {
    %c0_i32 = arith.constant 0 : i32
    %c0_i32_0 = arith.constant 0 : i32
    return %arg0, %arg1, %c0_i32 : i32, i32, i32
  }
  func.func @transform_2(%arg0: i32, %arg1: i32) -> (i32, i32) {
    %c0_i32 = arith.constant 0 : i32
    %c0_i32_0 = arith.constant 0 : i32
    return %arg1, %c0_i32 : i32, i32
  }
  func.func @transform_3(%arg0: i32, %arg1: i32) -> (i32, i32, i32) {
    %c0_i32 = arith.constant 0 : i32
    %c0_i32_0 = arith.constant 0 : i32
    return %arg0, %c0_i32, %arg1 : i32, i32, i32
  }
  func.func @transform_4(%arg0: i32, %arg1: i32) -> (i32, i32, i32) {
    %c0_i32 = arith.constant 0 : i32
    %c0_i32_0 = arith.constant 0 : i32
    return %arg0, %c0_i32, %arg1 : i32, i32, i32
  }
}

</mosaic_0001>

<bundles_post_ra>
// kernel: tpu_custom_call.1
= control target key start
LH: loop header
LB: loop body
LE: loop exit
PB: predicated region body
PF: predicated region fallthrough
CT: control target
= control target key end

     0   :  { %10 = vsyncpa [#allocation3], 0  ;;  %s1652_s0 = inlined_call_operand.vmem [shape: f32[2,300,4], index: 0, kind: input, shape index: {}]   ;;  %s1653_s1 = inlined_call_operand.vmem [shape: f32[2,300,8], index: 1, kind: input, shape index: {}]   ;;  %s1654_s2 = inlined_call_operand.vmem [shape: f32[300,4], index: 2, kind: input, shape index: {}]   ;;  %s1655_s3 = inlined_call_operand.hbm [shape: f32[2,4,300], index: 3, kind: output, shape index: {0}]   ;;  %s1656_s4 = inlined_call_operand.vmem [shape: f32[2,7,300], index: 4, kind: output, shape index: {1}]  }
   0x1   :  { %12 = vsyncpa [#allocation3 + $0x1], 0  ;;  %s1293_s15 = smov 0   ;;  %s1295_s16 = smov 0  }
   0x2   :  { %s1297_s17 = smov 0   ;;  %s1299_s18 = smov 0  }
   0x3   :  { %s1301_s19 = smov 0   ;;  %s1303_s20 = smov 0  }
   0x4 LB: > { %s1099_s21 = sadd.s32 4294967295, %s1266_s20   ;;  %s1100_s22 = sadd.s32 4294967294, %s1266_s20   ;;  %s1266_s20 = sphi %s1303_s20, %s18_s20   ;;  %s1262_s19 = sphi %s1301_s19, %s1663_s19   ;;  %s1258_s18 = sphi %s1299_s18, %s1662_s18   ;;  %s1254_s17 = sphi %s1297_s17, %s1661_s17   ;;  %s1250_s16 = sphi %s1295_s16, %s1660_s16   ;;  %s1246_s15 = sphi %s1293_s15, %s1659_s15  }
   0x5   : > { %s30_s23 = sadd.s32 1, %s1262_s19  ;;  %s121_s24 = sadd.s32 1, %s1254_s17 }
   0x6   : > { %p32_p0 = scmp.ge.s32.totalorder %s30_s23, 2  ;;  %p131_p1 = scmp.ne.s32.totalorder %s1254_s17, %s1250_s16 }
   0x7   : > { %p132_p2 = scmp.eq.s32.totalorder %s1099_s21, 1  ;;  %p137_p3 = scmp.ne.s32.totalorder %s1250_s16, %s1246_s15 }
   0x8   : > { %s1665_s23 = smov (%p32_p0, %s30_s23), 0  ;;  %p138_p5 = scmp.eq.s32.totalorder %s1100_s22, 1 }
   0x9   : > { %p1333_p4 = por %p132_p2, %p131_p1  ;;  %s116_s26 = ssub.s32 %s1262_s19, %s1665_s23 }
   0xa   : > { %p1104_p6 = scmp.ge.s32.totalorder %s1266_s20, 1  ;;  %p119_p7 = scmp.eq.s32.totalorder %s116_s26, 0 }
   0xb   : > { %p1340_p8 = por %p138_p5, %p137_p3  ;;  %p231_p9 = scmp.lt.s32.totalorder %s1266_s20, 3 }
   0xc   : > { %s1346_s28 = scalar_select %p119_p7, %s1254_s17, %s121_s24  }
   0xd   : > { %p232_p10 = pnand %p1104_p6, %p231_p9 }
   0xe   : > { %p293_p11 = scmp.lt.s32.totalorder (!%p232_p10), %s1258_s18, 1  ;;  %s1114_s9 = smul.u32 (!%p232_p10), 12, %s1258_s18 }
   0xf   : > { %235 = sbr.rel (%p232_p10) target bundleno = 502 (0x1f6), region = 32 }
  0x10   : > { %s944_s13 = scalar_lea.hbm (!%p232_p10), %s1655_s3, %s1114_s9 }
  0x11   : > { %s948_s21 = sshll.u32 (!%p232_p10), %s944_s13, 4  ;;  %s949_s21 = int_to_ptr.hbm [resolvable:$true] %s948_s21 }
  0x12   : > { %s1202_s24 = sshra.s32 (!%p232_p10), %s949_s21, 4  ;;  %s1203_s24 = int_to_ptr.hbm [resolvable:$true] %s1202_s24 }
  0x13   : > { %s1204_s26 = scalar_lea.hbm (!%p232_p10), %s1203_s24, 12  ;;  %p1209_p1 = scmp.lt.s32.totalorder (!%p232_p10), %s1203_s24, %s1655_s3 }
  0x14   : > { %s1350_s29 = scalar_select %p293_p11, %s1258_s18, 1  ;;  %v515_v48 = vld [vmem:[%s1654_s2 + $0x100] sm:$0xff]  ;;  %v516_v51 = vld [vmem:[%s1654_s2 + $0x108] sm:$0xff]  ;;  %v517_v54 = vld [vmem:[%s1654_s2 + $0x110] sm:$0xff]  ;;  %vm909_vm0 = vcmask 1041408   ;;  %vm916_vm1 = vcmask 1043456  }
  0x15   : > { %v499_v49 = vld [vmem:[%s1654_s2 + $0x80] sm:$0xff]  ;;  %v500_v52 = vld [vmem:[%s1654_s2 + $0x88] sm:$0xff]  ;;  %v501_v55 = vld [vmem:[%s1654_s2 + $0x90] sm:$0xff]  ;;  %p1205_p12 = scmp.ne.s32.totalorder %s1203_s24, %s1204_s26 }
  0x16   : > { %s1112_s30 = smul.u32 304, %s1350_s29  ;;  %v483_v50 = vld [vmem:[%s1654_s2] sm:$0xff]  ;;  %v484_v53 = vld [vmem:[%s1654_s2 + $0x8] sm:$0xff]  ;;  %v485_v56 = vld [vmem:[%s1654_s2 + $0x10] sm:$0xff] }
  0x17   : > { %v518_v57 = vld [vmem:[%s1654_s2 + $0x118] sm:$0xff]  ;;  %v519_v60 = vld [vmem:[%s1654_s2 + $0x120] sm:$0xff]  ;;  %v520_v63 = vld [vmem:[%s1654_s2 + $0x128] sm:$0xff]  ;;  %p1206_p13 = pnand %p1205_p12, %p1333_p4 }
  0x18   : > { %s1358_s7 = scalar_lea.vmem %s1652_s0, %s1112_s30  ;;  %v502_v58 = vld [vmem:[%s1654_s2 + $0x98] sm:$0xff]  ;;  %v503_v61 = vld [vmem:[%s1654_s2 + $0xa0] sm:$0xff]  ;;  %s1557_s8 = scalar_lea.vmem %s1653_s1, %s1112_s30 }
  0x19   : > { %v371_v0 = vld [vmem:[%s1358_s7 + $0x100] sm:$0xff]  ;;  %v372_v3 = vld [vmem:[%s1358_s7 + $0x108] sm:$0xff]  ;;  %v373_v6 = vld [vmem:[%s1358_s7 + $0x110] sm:$0xff]  ;;  %s276_s30 = sand.u32 1, %s1250_s16   ;;  %p1207_p0 = pneg %p1206_p13 }
  0x1a   : > { %v355_v1 = vld [vmem:[%s1358_s7 + $0x80] sm:$0xff]  ;;  %451 = vxpose.xlu2.b32.start [1/16] (narrow) %v371_v0, 8  ;;  %v356_v4 = vld [vmem:[%s1358_s7 + $0x88] sm:$0xff]  ;;  %v357_v7 = vld [vmem:[%s1358_s7 + $0x90] sm:$0xff]  ;;  %s1111_s10 = smul.u32 12, %s276_s30  ;;  %s922_s22 = scalar_lea.sflag [#allocation3], %s276_s30 }
  0x1b   : > { %v339_v2 = vld [vmem:[%s1358_s7] sm:$0xff]  ;;  %419 = vxpose.xlu1.b32.start [1/16] (narrow) %v355_v1, 8  ;;  %v340_v5 = vld [vmem:[%s1358_s7 + $0x8] sm:$0xff]  ;;  %v341_v8 = vld [vmem:[%s1358_s7 + $0x10] sm:$0xff] }
  0x1c   : > { %387 = vxpose.xlu0.b32.start [1/16] (narrow) %v339_v2, 8  ;;  %v374_v9 = vld [vmem:[%s1358_s7 + $0x118] sm:$0xff]  ;;  %v375_v12 = vld [vmem:[%s1358_s7 + $0x120] sm:$0xff]  ;;  %v376_v15 = vld [vmem:[%s1358_s7 + $0x128] sm:$0xff]  ;;  %s278_s18 = scalar_lea.vmem [#allocation2], %s1111_s10 }
  0x1d   : > { %v358_v10 = vld [vmem:[%s1358_s7 + $0x98] sm:$0xff]  ;;  %v359_v13 = vld [vmem:[%s1358_s7 + $0xa0] sm:$0xff]  ;;  %v360_v16 = vld [vmem:[%s1358_s7 + $0xa8] sm:$0xff]  ;;  %s946_s14 = sshll.u32 %s278_s18, 4  ;;  %s947_s14 = int_to_ptr.vmem [resolvable:$true] %s946_s14 }
  0x1e   : > { %v342_v11 = vld [vmem:[%s1358_s7 + $0x18] sm:$0xff]  ;;  %v343_v14 = vld [vmem:[%s1358_s7 + $0x20] sm:$0xff]  ;;  %v344_v17 = vld [vmem:[%s1358_s7 + $0x28] sm:$0xff] }
  0x1f   : > { %v377_v18 = vld [vmem:[%s1358_s7 + $0x130] sm:$0xff]  ;;  %v378_v21 = vld [vmem:[%s1358_s7 + $0x138] sm:$0xff]  ;;  %v379_v24 = vld [vmem:[%s1358_s7 + $0x140] sm:$0xff] }
  0x20   : > { %v361_v19 = vld [vmem:[%s1358_s7 + $0xb0] sm:$0xff]  ;;  %v362_v22 = vld [vmem:[%s1358_s7 + $0xb8] sm:$0xff]  ;;  %v363_v25 = vld [vmem:[%s1358_s7 + $0xc0] sm:$0xff] }
  0x21   : > { %v345_v20 = vld [vmem:[%s1358_s7 + $0x30] sm:$0xff]  ;;  %v346_v23 = vld [vmem:[%s1358_s7 + $0x38] sm:$0xff]  ;;  %v347_v26 = vld [vmem:[%s1358_s7 + $0x40] sm:$0xff] }
  0x22   : > { %452 = vxpose.xlu2.b32.cont [2/16] (narrow) %v372_v3, 8  ;;  %v380_v27 = vld [vmem:[%s1358_s7 + $0x148] sm:$0xff]  ;;  %v381_v30 = vld [vmem:[%s1358_s7 + $0x150] sm:$0xff]  ;;  %v382_v33 = vld [vmem:[%s1358_s7 + $0x158] sm:$0xff] }
  0x23   : > { %420 = vxpose.xlu1.b32.cont [2/16] (narrow) %v356_v4, 8  ;;  %v364_v28 = vld [vmem:[%s1358_s7 + $0xc8] sm:$0xff]  ;;  %v365_v31 = vld [vmem:[%s1358_s7 + $0xd0] sm:$0xff]  ;;  %v366_v34 = vld [vmem:[%s1358_s7 + $0xd8] sm:$0xff] }
  0x24   : > { %388 = vxpose.xlu0.b32.cont [2/16] (narrow) %v340_v5, 8  ;;  %v348_v29 = vld [vmem:[%s1358_s7 + $0x48] sm:$0xff]  ;;  %v349_v32 = vld [vmem:[%s1358_s7 + $0x50] sm:$0xff]  ;;  %v350_v35 = vld [vmem:[%s1358_s7 + $0x58] sm:$0xff] }
  0x25   : > { %v383_v36 = vld [vmem:[%s1358_s7 + $0x160] sm:$0xff]  ;;  %v384_v39 = vld [vmem:[%s1358_s7 + $0x168] sm:$0xff]  ;;  %v385_v42 = vld [vmem:[%s1358_s7 + $0x170] sm:$0xff] }
  0x26   : > { %v367_v37 = vld [vmem:[%s1358_s7 + $0xe0] sm:$0xff]  ;;  %v368_v40 = vld [vmem:[%s1358_s7 + $0xe8] sm:$0xff]  ;;  %v369_v43 = vld [vmem:[%s1358_s7 + $0xf0] sm:$0xff] }
  0x27   : > { %v351_v38 = vld [vmem:[%s1358_s7 + $0x60] sm:$0xff]  ;;  %v352_v41 = vld [vmem:[%s1358_s7 + $0x68] sm:$0xff]  ;;  %v353_v44 = vld [vmem:[%s1358_s7 + $0x70] sm:$0xff] }
  0x28   : > { %v386_v45 = vld [vmem:[%s1358_s7 + $0x178] sm:$0xff]  ;;  %v487_v62 = vld [vmem:[%s1654_s2 + $0x20] sm:$0xff]  ;;  %v504_v0 = vld [vmem:[%s1654_s2 + $0xa8] sm:$0xff] }
  0x29   : > { %v370_v46 = vld [vmem:[%s1358_s7 + $0xf8] sm:$0xff]  ;;  %v488_v1 = vld [vmem:[%s1654_s2 + $0x28] sm:$0xff]  ;;  %v521_v2 = vld [vmem:[%s1654_s2 + $0x130] sm:$0xff] }
  0x2a   : > { %453 = vxpose.xlu2.b32.cont [3/16] (narrow) %v373_v6, 8  ;;  %v354_v47 = vld [vmem:[%s1358_s7 + $0x78] sm:$0xff]  ;;  %v505_v3 = vld [vmem:[%s1654_s2 + $0xb0] sm:$0xff]  ;;  %s1208_s7 = scalar_lea.hbm %s1655_s3, 24 }
  0x2b   : > { %421 = vxpose.xlu1.b32.cont [3/16] (narrow) %v357_v7, 8  ;;  %v486_v59 = vld [vmem:[%s1654_s2 + $0x18] sm:$0xff]  ;;  %v489_v4 = vld [vmem:[%s1654_s2 + $0x30] sm:$0xff]  ;;  %p1210_p2 = scmp.lt.s32.totalorder %s1208_s7, %s1204_s26 }
  0x2c   : > { %389 = vxpose.xlu0.b32.cont [3/16] (narrow) %v341_v8, 8  ;;  %v522_v5 = vld [vmem:[%s1654_s2 + $0x138] sm:$0xff]  ;;  %v523_v8 = vld [vmem:[%s1654_s2 + $0x140] sm:$0xff] }
  0x2d   : > { %v506_v6 = vld [vmem:[%s1654_s2 + $0xb8] sm:$0xff]  ;;  %p1211_p3 = por %p1210_p2, %p1209_p1 }
  0x2e   : > { %v490_v7 = vld [vmem:[%s1654_s2 + $0x38] sm:$0xff] }
  0x2f   : > { %p1212_p5 = pnand %p1211_p3, %p1207_p0 }
  0x32   : > { %454 = vxpose.xlu2.b32.cont [4/16] (narrow) %v374_v9, 8  ;;  %v507_v9 = vld [vmem:[%s1654_s2 + $0xc0] sm:$0xff] }
  0x33   : > { %422 = vxpose.xlu1.b32.cont [4/16] (narrow) %v358_v10, 8  ;;  %v491_v10 = vld [vmem:[%s1654_s2 + $0x40] sm:$0xff] }
  0x34   : > { %390 = vxpose.xlu0.b32.cont [4/16] (narrow) %v342_v11, 8  ;;  %v524_v11 = vld [vmem:[%s1654_s2 + $0x148] sm:$0xff] }
  0x3a   : > { %455 = vxpose.xlu2.b32.cont [5/16] (narrow) %v375_v12, 8  ;;  %v508_v12 = vld [vmem:[%s1654_s2 + $0xc8] sm:$0xff] }
  0x3b   : > { %423 = vxpose.xlu1.b32.cont [5/16] (narrow) %v359_v13, 8  ;;  %v492_v13 = vld [vmem:[%s1654_s2 + $0x48] sm:$0xff] }
  0x3c   : > { %391 = vxpose.xlu0.b32.cont [5/16] (narrow) %v343_v14, 8  ;;  %v525_v14 = vld [vmem:[%s1654_s2 + $0x150] sm:$0xff] }
  0x42   : > { %456 = vxpose.xlu2.b32.cont [6/16] (narrow) %v376_v15, 8  ;;  %v509_v15 = vld [vmem:[%s1654_s2 + $0xd0] sm:$0xff] }
  0x43   : > { %424 = vxpose.xlu1.b32.cont [6/16] (narrow) %v360_v16, 8  ;;  %v493_v16 = vld [vmem:[%s1654_s2 + $0x50] sm:$0xff] }
  0x44   : > { %392 = vxpose.xlu0.b32.cont [6/16] (narrow) %v344_v17, 8  ;;  %v526_v17 = vld [vmem:[%s1654_s2 + $0x158] sm:$0xff] }
  0x4a   : > { %457 = vxpose.xlu2.b32.cont [7/16] (narrow) %v377_v18, 8  ;;  %v510_v18 = vld [vmem:[%s1654_s2 + $0xd8] sm:$0xff] }
  0x4b   : > { %425 = vxpose.xlu1.b32.cont [7/16] (narrow) %v361_v19, 8  ;;  %v494_v19 = vld [vmem:[%s1654_s2 + $0x58] sm:$0xff] }
  0x4c   : > { %393 = vxpose.xlu0.b32.cont [7/16] (narrow) %v345_v20, 8  ;;  %v527_v20 = vld [vmem:[%s1654_s2 + $0x160] sm:$0xff] }
  0x52   : > { %458 = vxpose.xlu2.b32.cont [8/16] (narrow) %v378_v21, 8  ;;  %v511_v21 = vld [vmem:[%s1654_s2 + $0xe0] sm:$0xff] }
  0x53   : > { %426 = vxpose.xlu1.b32.cont [8/16] (narrow) %v362_v22, 8  ;;  %v495_v22 = vld [vmem:[%s1654_s2 + $0x60] sm:$0xff] }
  0x54   : > { %394 = vxpose.xlu0.b32.cont [8/16] (narrow) %v346_v23, 8  ;;  %v528_v23 = vld [vmem:[%s1654_s2 + $0x168] sm:$0xff] }
  0x5a   : > { %459 = vxpose.xlu2.b32.cont [9/16] (narrow) %v379_v24, 8  ;;  %v512_v24 = vld [vmem:[%s1654_s2 + $0xe8] sm:$0xff] }
  0x5b   : > { %427 = vxpose.xlu1.b32.cont [9/16] (narrow) %v363_v25, 8  ;;  %v496_v25 = vld [vmem:[%s1654_s2 + $0x68] sm:$0xff] }
  0x5c   : > { %395 = vxpose.xlu0.b32.cont [9/16] (narrow) %v347_v26, 8  ;;  %v529_v26 = vld [vmem:[%s1654_s2 + $0x170] sm:$0xff] }
  0x62   : > { %460 = vxpose.xlu2.b32.cont [10/16] (narrow) %v380_v27, 8  ;;  %v513_v27 = vld [vmem:[%s1654_s2 + $0xf0] sm:$0xff] }
  0x63   : > { %428 = vxpose.xlu1.b32.cont [10/16] (narrow) %v364_v28, 8  ;;  %v497_v28 = vld [vmem:[%s1654_s2 + $0x70] sm:$0xff] }
  0x64   : > { %396 = vxpose.xlu0.b32.cont [10/16] (narrow) %v348_v29, 8  ;;  %v530_v29 = vld [vmem:[%s1654_s2 + $0x178] sm:$0xff] }
  0x6a   : > { %461 = vxpose.xlu2.b32.cont [11/16] (narrow) %v381_v30, 8  ;;  %v514_v30 = vld [vmem:[%s1654_s2 + $0xf8] sm:$0xff] }
  0x6b   : > { %429 = vxpose.xlu1.b32.cont [11/16] (narrow) %v365_v31, 8  ;;  %v498_v31 = vld [vmem:[%s1654_s2 + $0x78] sm:$0xff] }
  0x6c   : > { %397 = vxpose.xlu0.b32.cont [11/16] (narrow) %v349_v32, 8  ;;  %v659_v32 = vld [vmem:[%s1557_s8 + $0x100] sm:$0xff] }
  0x72   : > { %462 = vxpose.xlu2.b32.cont [12/16] (narrow) %v382_v33, 8  ;;  %v643_v33 = vld [vmem:[%s1557_s8 + $0x80] sm:$0xff] }
  0x73   : > { %430 = vxpose.xlu1.b32.cont [12/16] (narrow) %v366_v34, 8  ;;  %v627_v34 = vld [vmem:[%s1557_s8] sm:$0xff] }
  0x74   : > { %398 = vxpose.xlu0.b32.cont [12/16] (narrow) %v350_v35, 8  ;;  %v660_v35 = vld [vmem:[%s1557_s8 + $0x108] sm:$0xff] }
  0x7a   : > { %463 = vxpose.xlu2.b32.cont [13/16] (narrow) %v383_v36, 8  ;;  %v644_v36 = vld [vmem:[%s1557_s8 + $0x88] sm:$0xff] }
  0x7b   : > { %431 = vxpose.xlu1.b32.cont [13/16] (narrow) %v367_v37, 8  ;;  %v628_v37 = vld [vmem:[%s1557_s8 + $0x8] sm:$0xff] }
  0x7c   : > { %399 = vxpose.xlu0.b32.cont [13/16] (narrow) %v351_v38, 8  ;;  %v661_v38 = vld [vmem:[%s1557_s8 + $0x110] sm:$0xff] }
  0x82   : > { %464 = vxpose.xlu2.b32.cont [14/16] (narrow) %v384_v39, 8  ;;  %v645_v39 = vld [vmem:[%s1557_s8 + $0x90] sm:$0xff] }
  0x83   : > { %432 = vxpose.xlu1.b32.cont [14/16] (narrow) %v368_v40, 8  ;;  %v629_v40 = vld [vmem:[%s1557_s8 + $0x10] sm:$0xff] }
  0x84   : > { %400 = vxpose.xlu0.b32.cont [14/16] (narrow) %v352_v41, 8  ;;  %v662_v41 = vld [vmem:[%s1557_s8 + $0x118] sm:$0xff] }
  0x8a   : > { %465 = vxpose.xlu2.b32.cont [15/16] (narrow) %v385_v42, 8  ;;  %v646_v42 = vld [vmem:[%s1557_s8 + $0x98] sm:$0xff] }
  0x8b   : > { %433 = vxpose.xlu1.b32.cont [15/16] (narrow) %v369_v43, 8  ;;  %v630_v43 = vld [vmem:[%s1557_s8 + $0x18] sm:$0xff] }
  0x8c   : > { %401 = vxpose.xlu0.b32.cont [15/16] (narrow) %v353_v44, 8  ;;  %v663_v44 = vld [vmem:[%s1557_s8 + $0x120] sm:$0xff] }
  0x92   : > { %466 = vxpose.xlu2.b32.end [16/16] (narrow) %v386_v45, 8  ;;  %v647_v45 = vld [vmem:[%s1557_s8 + $0xa0] sm:$0xff] }
  0x93   : > { %434 = vxpose.xlu1.b32.end [16/16] (narrow) %v370_v46, 8  ;;  %v631_v46 = vld [vmem:[%s1557_s8 + $0x20] sm:$0xff] }
  0x94   : > { %402 = vxpose.xlu0.b32.end [16/16] (narrow) %v354_v47, 8  ;;  %v664_v47 = vld [vmem:[%s1557_s8 + $0x128] sm:$0xff] }
  0x9a   : > { %595 = vxpose.xlu2.b32.start [1/16] (narrow) %v515_v48, 8  ;;  %v648_v48 = vld [vmem:[%s1557_s8 + $0xa8] sm:$0xff] }
  0x9b   : > { %563 = vxpose.xlu1.b32.start [1/16] (narrow) %v499_v49, 8  ;;  %v632_v49 = vld [vmem:[%s1557_s8 + $0x28] sm:$0xff] }
  0x9c   : > { %531 = vxpose.xlu0.b32.start [1/16] (narrow) %v483_v50, 8  ;;  %v665_v50 = vld [vmem:[%s1557_s8 + $0x130] sm:$0xff] }
  0xa2   : > { %596 = vxpose.xlu2.b32.cont [2/16] (narrow) %v516_v51, 8  ;;  %v649_v51 = vld [vmem:[%s1557_s8 + $0xb0] sm:$0xff] }
  0xa3   : > { %564 = vxpose.xlu1.b32.cont [2/16] (narrow) %v500_v52, 8  ;;  %v633_v52 = vld [vmem:[%s1557_s8 + $0x30] sm:$0xff] }
  0xa4   : > { %532 = vxpose.xlu0.b32.cont [2/16] (narrow) %v484_v53, 8  ;;  %v666_v53 = vld [vmem:[%s1557_s8 + $0x138] sm:$0xff] }
  0xaa   : > { %597 = vxpose.xlu2.b32.cont [3/16] (narrow) %v517_v54, 8  ;;  %v650_v54 = vld [vmem:[%s1557_s8 + $0xb8] sm:$0xff] }
  0xab   : > { %565 = vxpose.xlu1.b32.cont [3/16] (narrow) %v501_v55, 8  ;;  %v634_v55 = vld [vmem:[%s1557_s8 + $0x38] sm:$0xff] }
  0xac   : > { %533 = vxpose.xlu0.b32.cont [3/16] (narrow) %v485_v56, 8  ;;  %v667_v56 = vld [vmem:[%s1557_s8 + $0x140] sm:$0xff] }
  0xb2   : > { %598 = vxpose.xlu2.b32.cont [4/16] (narrow) %v518_v57, 8  ;;  %v651_v57 = vld [vmem:[%s1557_s8 + $0xc0] sm:$0xff] }
  0xb3   : > { %566 = vxpose.xlu1.b32.cont [4/16] (narrow) %v502_v58, 8  ;;  %v635_v58 = vld [vmem:[%s1557_s8 + $0x40] sm:$0xff] }
  0xb4   : > { %534 = vxpose.xlu0.b32.cont [4/16] (narrow) %v486_v59, 8  ;;  %v668_v59 = vld [vmem:[%s1557_s8 + $0x148] sm:$0xff] }
  0xba   : > { %599 = vxpose.xlu2.b32.cont [5/16] (narrow) %v519_v60, 8  ;;  %v652_v60 = vld [vmem:[%s1557_s8 + $0xc8] sm:$0xff] }
  0xbb   : > { %567 = vxpose.xlu1.b32.cont [5/16] (narrow) %v503_v61, 8  ;;  %v636_v61 = vld [vmem:[%s1557_s8 + $0x48] sm:$0xff] }
  0xbc   : > { %535 = vxpose.xlu0.b32.cont [5/16] (narrow) %v487_v62, 8  ;;  %v669_v62 = vld [vmem:[%s1557_s8 + $0x150] sm:$0xff] }
  0xc2   : > { %600 = vxpose.xlu2.b32.cont [6/16] (narrow) %v520_v63, 8  ;;  %v653_v63 = vld [vmem:[%s1557_s8 + $0xd0] sm:$0xff] }
  0xc3   : > { %568 = vxpose.xlu1.b32.cont [6/16] (narrow) %v504_v0, 8  ;;  %v637_v0 = vld [vmem:[%s1557_s8 + $0x50] sm:$0xff] }
  0xc4   : > { %536 = vxpose.xlu0.b32.cont [6/16] (narrow) %v488_v1, 8  ;;  %v670_v1 = vld [vmem:[%s1557_s8 + $0x158] sm:$0xff] }
  0xca   : > { %601 = vxpose.xlu2.b32.cont [7/16] (narrow) %v521_v2, 8  ;;  %v654_v2 = vld [vmem:[%s1557_s8 + $0xd8] sm:$0xff] }
  0xcb   : > { %569 = vxpose.xlu1.b32.cont [7/16] (narrow) %v505_v3, 8  ;;  %v638_v3 = vld [vmem:[%s1557_s8 + $0x58] sm:$0xff] }
  0xcc   : > { %537 = vxpose.xlu0.b32.cont [7/16] (narrow) %v489_v4, 8  ;;  %v435_v4 = vpop.trf.xlu1 }
  0xd2   : > { %602 = vxpose.xlu2.b32.cont [8/16] (narrow) %v522_v5, 8  ;;  %v467_v5 = vpop.trf.xlu2 }
  0xd3   : > { %570 = vxpose.xlu1.b32.cont [8/16] (narrow) %v506_v6, 8  ;;  %v862_v6 = vmul.f32 0.2, %v435_v4 }
  0xd4   : > { %538 = vxpose.xlu0.b32.cont [8/16] (narrow) %v490_v7, 8  ;;  %v403_v7 = vpop.trf.xlu0 }
  0xda   : > { %603 = vxpose.xlu2.b32.cont [9/16] (narrow) %v523_v8, 8  ;;  %v863_v8 = vmul.f32 0.2, %v467_v5 }
  0xdb   : > { %571 = vxpose.xlu1.b32.cont [9/16] (narrow) %v507_v9, 8  ;;  %v861_v9 = vmul.f32 0.2, %v403_v7 }
  0xdc   : > { %539 = vxpose.xlu0.b32.cont [9/16] (narrow) %v491_v10, 8  ;;  %v866_v10 = vmul.f32 1.442695, %v862_v6 }
  0xde   : > { %1170 = vpow2.f32 %v866_v10 }
  0xe2   : > { %604 = vxpose.xlu2.b32.cont [10/16] (narrow) %v524_v11, 8  ;;  %v671_v11 = vld [vmem:[%s1557_s8 + $0x160] sm:$0xff] }
  0xe3   : > { %572 = vxpose.xlu1.b32.cont [10/16] (narrow) %v508_v12, 8  ;;  %v655_v12 = vld [vmem:[%s1557_s8 + $0xe0] sm:$0xff] }
  0xe4   : > { %540 = vxpose.xlu0.b32.cont [10/16] (narrow) %v492_v13, 8  ;;  %v868_v13 = vmul.f32 1.442695, %v863_v8 }
  0xe6   : > { %1172 = vpow2.f32 %v868_v13 }
  0xea   : > { %605 = vxpose.xlu2.b32.cont [11/16] (narrow) %v525_v14, 8  ;;  %v864_v14 = vmul.f32 1.442695, %v861_v9 }
  0xeb   : > { %573 = vxpose.xlu1.b32.cont [11/16] (narrow) %v509_v15, 8  ;;  %v639_v15 = vld [vmem:[%s1557_s8 + $0x60] sm:$0xff] }
  0xec   : > { %541 = vxpose.xlu0.b32.cont [11/16] (narrow) %v493_v16, 8  ;;  %1174 = vpow2.f32 %v864_v14 }
  0xf2   : > { %606 = vxpose.xlu2.b32.cont [12/16] (narrow) %v526_v17, 8 }
  0xf3   : > { %574 = vxpose.xlu1.b32.cont [12/16] (narrow) %v510_v18, 8 }
  0xf4   : > { %542 = vxpose.xlu0.b32.cont [12/16] (narrow) %v494_v19, 8  ;;  %v1171_v19 = vpop.eup %1170 }
  0xfa   : > { %607 = vxpose.xlu2.b32.cont [13/16] (narrow) %v527_v20, 8  ;;  %v844_v20 = vmul.f32 0.1, %v435_v4 }
  0xfb   : > { %575 = vxpose.xlu1.b32.cont [13/16] (narrow) %v511_v21, 8 }
  0xfc   : > { %543 = vxpose.xlu0.b32.cont [13/16] (narrow) %v495_v22, 8  ;;  %v1173_v22 = vpop.eup %1172 }
 0x102   : > { %608 = vxpose.xlu2.b32.cont [14/16] (narrow) %v528_v23, 8  ;;  %v672_v23 = vld [vmem:[%s1557_s8 + $0x168] sm:$0xff] }
 0x103   : > { %576 = vxpose.xlu1.b32.cont [14/16] (narrow) %v512_v24, 8  ;;  %v656_v24 = vld [vmem:[%s1557_s8 + $0xe8] sm:$0xff] }
 0x104   : > { %544 = vxpose.xlu0.b32.cont [14/16] (narrow) %v496_v25, 8  ;;  %v845_v25 = vmul.f32 0.1, %v467_v5 }
 0x10a   : > { %609 = vxpose.xlu2.b32.cont [15/16] (narrow) %v529_v26, 8 }
 0x10b   : > { %577 = vxpose.xlu1.b32.cont [15/16] (narrow) %v513_v27, 8  ;;  %v1175_v27 = vpop.eup %1174 }
 0x10c   : > { %545 = vxpose.xlu0.b32.cont [15/16] (narrow) %v497_v28, 8  ;;  %v640_v28 = vld [vmem:[%s1557_s8 + $0x68] sm:$0xff] }
 0x112   : > { %610 = vxpose.xlu2.b32.end [16/16] (narrow) %v530_v29, 8  ;;  %v843_v29 = vmul.f32 0.1, %v403_v7 }
 0x113   : > { %578 = vxpose.xlu1.b32.end [16/16] (narrow) %v514_v30, 8 }
 0x114   : > { %546 = vxpose.xlu0.b32.end [16/16] (narrow) %v498_v31, 8 }
 0x11a   : > { %739 = vxpose.xlu2.b32.start [1/16] (narrow) %v659_v32, 8 }
 0x11b   : > { %707 = vxpose.xlu1.b32.start [1/16] (narrow) %v643_v33, 8 }
 0x11c   : > { %675 = vxpose.xlu0.b32.start [1/16] (narrow) %v627_v34, 8 }
 0x122   : > { %740 = vxpose.xlu2.b32.cont [2/16] (narrow) %v660_v35, 8 }
 0x123   : > { %708 = vxpose.xlu1.b32.cont [2/16] (narrow) %v644_v36, 8 }
 0x124   : > { %676 = vxpose.xlu0.b32.cont [2/16] (narrow) %v628_v37, 8 }
 0x12a   : > { %741 = vxpose.xlu2.b32.cont [3/16] (narrow) %v661_v38, 8 }
 0x12b   : > { %709 = vxpose.xlu1.b32.cont [3/16] (narrow) %v645_v39, 8 }
 0x12c   : > { %677 = vxpose.xlu0.b32.cont [3/16] (narrow) %v629_v40, 8 }
 0x132   : > { %742 = vxpose.xlu2.b32.cont [4/16] (narrow) %v662_v41, 8 }
 0x133   : > { %710 = vxpose.xlu1.b32.cont [4/16] (narrow) %v646_v42, 8  ;;  %v611_v17 = vpop.trf.xlu2  ;;  %v673_v42 = vld [vmem:[%s1557_s8 + $0x170] sm:$0xff] }
 0x134   : > { %678 = vxpose.xlu0.b32.cont [4/16] (narrow) %v630_v43, 8  ;;  %v851_v30 = vrot.slane %v611_v17, 2  ;;  %v872_v31 = vmul.f32 %v1173_v22, %v611_v17  ;;  %v657_v43 = vld [vmem:[%s1557_s8 + $0xf0] sm:$0xff] }
 0x136   : > { %v857_v36 = vmul.f32 %v851_v30, %v845_v25  ;;  %v875_v37 = vmul.f32 0.5, %v872_v31 }
 0x13a   : > { %743 = vxpose.xlu2.b32.cont [5/16] (narrow) %v663_v44, 8  ;;  %v641_v44 = vld [vmem:[%s1557_s8 + $0x70] sm:$0xff] }
 0x13b   : > { %711 = vxpose.xlu1.b32.cont [5/16] (narrow) %v647_v45, 8  ;;  %v860_v45 = vadd.f32 %v857_v36, %v611_v17 }
 0x13c   : > { %679 = vxpose.xlu0.b32.cont [5/16] (narrow) %v631_v46, 8  ;;  %v881_v46 = vrot.slane %v875_v37, 2 }
 0x13f   : > { %v579_v16 = vpop.trf.xlu1 }
 0x140   : > { %v547_v18 = vpop.trf.xlu0  ;;  %v850_v21 = vrot.slane %v579_v16, 2  ;;  %v871_v26 = vmul.f32 %v1171_v19, %v579_v16 }
 0x141   : > { %v849_v32 = vrot.slane %v547_v18, 2  ;;  %v870_v33 = vmul.f32 %v1175_v27, %v547_v18 }
 0x142   : > { %744 = vxpose.xlu2.b32.cont [6/16] (narrow) %v664_v47, 8  ;;  %v856_v34 = vmul.f32 %v850_v21, %v844_v20  ;;  %v874_v35 = vmul.f32 0.5, %v871_v26 }
 0x143   : > { %712 = vxpose.xlu1.b32.cont [6/16] (narrow) %v648_v48, 8  ;;  %v855_v38 = vmul.f32 %v849_v32, %v843_v29  ;;  %v873_v39 = vmul.f32 0.5, %v870_v33 }
 0x144   : > { %680 = vxpose.xlu0.b32.cont [6/16] (narrow) %v632_v49, 8  ;;  %v859_v40 = vadd.f32 %v856_v34, %v579_v16  ;;  %v880_v41 = vrot.slane %v874_v35, 2 }
 0x145   : > { %v858_v47 = vadd.f32 %v855_v38, %v547_v18  ;;  %v879_v48 = vrot.slane %v873_v39, 2 }
 0x146   : > { %v886_v49 = vsub.f32 %v859_v40, %v880_v41 }
 0x14a   : > { %745 = vxpose.xlu2.b32.cont [7/16] (narrow) %v665_v50, 8  ;;  %v892_v50 = vrot.slane %v871_v26, 2 }
 0x14b   : > { %713 = vxpose.xlu1.b32.cont [7/16] (narrow) %v649_v51, 8  ;;  %v887_v51 = vsub.f32 %v860_v45, %v881_v46 }
 0x14c   : > { %681 = vxpose.xlu0.b32.cont [7/16] (narrow) %v633_v52, 8  ;;  %v893_v52 = vrot.slane %v872_v31, 2 }
 0x152   : > { %746 = vxpose.xlu2.b32.cont [8/16] (narrow) %v666_v53, 8  ;;  %v885_v53 = vsub.f32 %v858_v47, %v879_v48 }
 0x153   : > { %714 = vxpose.xlu1.b32.cont [8/16] (narrow) %v650_v54, 8  ;;  %v891_v54 = vrot.slane %v870_v33, 2 }
 0x154   : > { %682 = vxpose.xlu0.b32.cont [8/16] (narrow) %v634_v55, 8  ;;  %v898_v55 = vadd.f32 %v892_v50, %v886_v49 }
 0x15a   : > { %747 = vxpose.xlu2.b32.cont [9/16] (narrow) %v667_v56, 8  ;;  %v674_v56 = vld [vmem:[%s1557_s8 + $0x178] sm:$0xff] }
 0x15b   : > { %715 = vxpose.xlu1.b32.cont [9/16] (narrow) %v651_v57, 8  ;;  %v658_v57 = vld [vmem:[%s1557_s8 + $0xf8] sm:$0xff] }
 0x15c   : > { %683 = vxpose.xlu0.b32.cont [9/16] (narrow) %v635_v58, 8  ;;  %v642_v58 = vld [vmem:[%s1557_s8 + $0x78] sm:$0xff] }
 0x162   : > { %748 = vxpose.xlu2.b32.cont [10/16] (narrow) %v668_v59, 8  ;;  %v899_v59 = vadd.f32 %v893_v52, %v887_v51 }
 0x163   : > { %716 = vxpose.xlu1.b32.cont [10/16] (narrow) %v652_v60, 8  ;;  %v897_v60 = vadd.f32 %v891_v54, %v885_v53 }
 0x164   : > { %684 = vxpose.xlu0.b32.cont [10/16] (narrow) %v636_v61, 8  ;;  %v904_v61 = vrot.slane %v898_v55, 6 }
 0x16a   : > { %749 = vxpose.xlu2.b32.cont [11/16] (narrow) %v669_v62, 8  ;;  %v905_v62 = vrot.slane %v899_v59, 6 }
 0x16b   : > { %717 = vxpose.xlu1.b32.cont [11/16] (narrow) %v653_v63, 8  ;;  %v903_v63 = vrot.slane %v897_v60, 6 }
 0x16c   : > { %685 = vxpose.xlu0.b32.cont [11/16] (narrow) %v637_v0, 8  ;;  %v911_v0 = vsel %vm909_vm0, %v886_v49, %v904_v61 }
 0x172   : > { %750 = vxpose.xlu2.b32.cont [12/16] (narrow) %v670_v1, 8  ;;  %v915_v1 = vrot.slane %v911_v0, 4 }
 0x173   : > { %718 = vxpose.xlu1.b32.cont [12/16] (narrow) %v654_v2, 8  ;;  %v910_v2 = vsel %vm909_vm0, %v885_v53, %v903_v63 }
 0x174   : > { %686 = vxpose.xlu0.b32.cont [12/16] (narrow) %v638_v3, 8  ;;  %v912_v3 = vsel %vm909_vm0, %v887_v51, %v905_v62  ;;  %v917_v4 = vsel %vm916_vm1, %v910_v2, %v915_v1 }
 0x175   : > { %920 = vst [vmem:[%s278_s18 + $0x8] sm:$0xf] %v912_v3 }
 0x176   : > { %919 = vst [vmem:[%s278_s18] sm:$0xff] %v917_v4 }
 0x17a   : > { %751 = vxpose.xlu2.b32.cont [13/16] (narrow) %v671_v11, 8 }
 0x17b   : > { %719 = vxpose.xlu1.b32.cont [13/16] (narrow) %v655_v12, 8 }
 0x17c   : > { %687 = vxpose.xlu0.b32.cont [13/16] (narrow) %v639_v15, 8 }
 0x182   : > { %752 = vxpose.xlu2.b32.cont [14/16] (narrow) %v672_v23, 8 }
 0x183   : > { %720 = vxpose.xlu1.b32.cont [14/16] (narrow) %v656_v24, 8 }
 0x184   : > { %688 = vxpose.xlu0.b32.cont [14/16] (narrow) %v640_v28, 8 }
 0x18a   : > { %753 = vxpose.xlu2.b32.cont [15/16] (narrow) %v673_v42, 8 }
 0x18b   : > { %721 = vxpose.xlu1.b32.cont [15/16] (narrow) %v657_v43, 8 }
 0x18c   : > { %689 = vxpose.xlu0.b32.cont [15/16] (narrow) %v641_v44, 8 }
 0x192   : > { %754 = vxpose.xlu2.b32.end [16/16] (narrow) %v674_v56, 8 }
 0x193   : > { %722 = vxpose.xlu1.b32.end [16/16] (narrow) %v658_v57, 8 }
 0x194   : > { %690 = vxpose.xlu0.b32.end [16/16] (narrow) %v642_v58, 8 }
 0x195   : > { %1215 = shalt.err (!%p1212_p5)
}
 0x196   : > { %1115 = dma.vmem_to_hbm [thread:$0]  (%p1333_p4), %s947_s14, 192, %s949_s21, %s922_s22  }
 0x197   : > { %s1113_s25 = smul.u32 24, %s1350_s29 }
 0x199   : > { %s337_s11 = scalar_lea.vmem %s1656_s4, %s1113_s25 }
 0x1b3   : > { %v755_v5 = vpop.trf.xlu2 }
 0x1b4   : > { %v783_v6 = vrot.slane %v755_v5, 4 }
 0x1b6   : > { %v784_v7 = vmax.f32 %v755_v5, %v783_v6 }
 0x1b8   : > { %v785_v8 = vrot.slane %v784_v7, 2 }
 0x1ba   : > { %v786_v9 = vmax.f32 %v784_v7, %v785_v8 }
 0x1bc   : > { %v787_v10 = vrot.slane %v786_v9, 1 }
 0x1be   : > { %v788_v11 = vmax.f32 %v786_v9, %v787_v10 }
 0x1bf   : > { %v723_v12 = vpop.trf.xlu1 }
 0x1c0   : > { %v777_v13 = vrot.slane %v723_v12, 4  ;;  %v691_v14 = vpop.trf.xlu0  ;;  %v791_v15 = vsub.f32 %v755_v5, %v788_v11 }
 0x1c1   : > { %v771_v16 = vrot.slane %v691_v14, 4 }
 0x1c2   : > { %v778_v17 = vmax.f32 %v723_v12, %v777_v13  ;;  %v796_v18 = vmul.f32 1.442695, %v791_v15 }
 0x1c3   : > { %v772_v19 = vmax.f32 %v691_v14, %v771_v16 }
 0x1c4   : > { %v779_v20 = vrot.slane %v778_v17, 2  ;;  %1176 = vpow2.f32 %v796_v18 }
 0x1c5   : > { %v773_v21 = vrot.slane %v772_v19, 2 }
 0x1c6   : > { %v780_v22 = vmax.f32 %v778_v17, %v779_v20 }
 0x1c7   : > { %v774_v23 = vmax.f32 %v772_v19, %v773_v21 }
 0x1c8   : > { %v781_v24 = vrot.slane %v780_v22, 1 }
 0x1c9   : > { %v775_v25 = vrot.slane %v774_v23, 1 }
 0x1ca   : > { %v782_v26 = vmax.f32 %v780_v22, %v781_v24  ;;  %v1177_v27 = vpop.eup %1176 }
 0x1cb   : > { %v776_v28 = vmax.f32 %v774_v23, %v775_v25  ;;  %v810_v29 = vrot.slane %v1177_v27, 4 }
 0x1cc   : > { %v790_v30 = vsub.f32 %v723_v12, %v782_v26 }
 0x1cd   : > { %v789_v31 = vsub.f32 %v691_v14, %v776_v28  ;;  %v811_v32 = vadd.f32 %v1177_v27, %v810_v29 }
 0x1ce   : > { %v794_v33 = vmul.f32 1.442695, %v790_v30 }
 0x1cf   : > { %v792_v34 = vmul.f32 1.442695, %v789_v31  ;;  %v812_v35 = vrot.slane %v811_v32, 2 }
 0x1d0   : > { %1178 = vpow2.f32 %v794_v33 }
 0x1d1   : > { %1180 = vpow2.f32 %v792_v34  ;;  %v813_v36 = vadd.f32 %v812_v35, %v811_v32 }
 0x1d3   : > { %v814_v37 = vrot.slane %v813_v36, 1 }
 0x1d5   : > { %v815_v39 = vadd.f32 %v814_v37, %v813_v36 }
 0x1d6   : > { %v1179_v38 = vpop.eup %1178 }
 0x1d7   : > { %v1181_v40 = vpop.eup %1180  ;;  %v804_v41 = vrot.slane %v1179_v38, 4  ;;  %1182 = vrcp.f32 %v815_v39 }
 0x1d8   : > { %v798_v42 = vrot.slane %v1181_v40, 4 }
 0x1d9   : > { %v805_v43 = vadd.f32 %v1179_v38, %v804_v41 }
 0x1da   : > { %v799_v44 = vadd.f32 %v1181_v40, %v798_v42 }
 0x1db   : > { %v806_v45 = vrot.slane %v805_v43, 2 }
 0x1dc   : > { %v800_v46 = vrot.slane %v799_v44, 2 }
 0x1dd   : > { %v807_v47 = vadd.f32 %v806_v45, %v805_v43  ;;  %v1183_v48 = vpop.eup %1182 }
 0x1de   : > { %v801_v49 = vadd.f32 %v800_v46, %v799_v44  ;;  %v821_v50 = vmul.f32 %v1183_v48, %v815_v39 }
 0x1df   : > { %v808_v51 = vrot.slane %v807_v47, 1 }
 0x1e0   : > { %v802_v52 = vrot.slane %v801_v49, 1  ;;  %v824_v53 = vsub.f32 2.0, %v821_v50 }
 0x1e1   : > { %v809_v54 = vadd.f32 %v808_v51, %v807_v47 }
 0x1e2   : > { %v803_v55 = vadd.f32 %v802_v52, %v801_v49  ;;  %v827_v56 = vmul.f32 %v1183_v48, %v824_v53 }
 0x1e3   : > { %1184 = vrcp.f32 %v809_v54 }
 0x1e4   : > { %1186 = vrcp.f32 %v803_v55  ;;  %v830_v57 = vmul.f32 %v1177_v27, %v827_v56 }
 0x1e6   : > { %v836_v58 = vrot.slane %v830_v57, 1 }
 0x1e8   : > { %842 = vst [vmem:[%s337_s11 + $0x10] sm:$0x7f] %v836_v58 }
 0x1e9   : > { %v1185_v59 = vpop.eup %1184 }
 0x1ea   : > { %v1187_v60 = vpop.eup %1186  ;;  %v820_v61 = vmul.f32 %v1185_v59, %v809_v54 }
 0x1eb   : > { %v819_v62 = vmul.f32 %v1187_v60, %v803_v55 }
 0x1ec   : > { %v823_v63 = vsub.f32 2.0, %v820_v61 }
 0x1ed   : > { %v822_v0 = vsub.f32 2.0, %v819_v62 }
 0x1ee   : > { %v826_v1 = vmul.f32 %v1185_v59, %v823_v63 }
 0x1ef   : > { %v825_v2 = vmul.f32 %v1187_v60, %v822_v0 }
 0x1f0   : > { %v829_v3 = vmul.f32 %v1179_v38, %v826_v1 }
 0x1f1   : > { %v828_v4 = vmul.f32 %v1181_v40, %v825_v2 }
 0x1f2   : > { %v835_v5 = vrot.slane %v829_v3, 1 }
 0x1f3   : > { %v834_v6 = vrot.slane %v828_v4, 1 }
 0x1f4   : > { %841 = vst [vmem:[%s337_s11 + $0x8] sm:$0x7f] %v835_v5 }
 0x1f5   : > { %840 = vst [vmem:[%s337_s11] sm:$0x7f] %v834_v6 }
 0x1f6 PF: > { %p1121_p4 = scmp.ge.s32.totalorder %s1266_s20, 2  ;;  %s964_s29 = sand.u32 1, %s1246_s15  }
 0x1f7   : > { %s965_s12 = scalar_lea.sflag [#allocation3], %s964_s29 }
 0x1f8   : > { %p1118_p6 = pnand %p1121_p4, %p1340_p8 }
 0x1fa   : > { %p1119_p7 = pneg %p1118_p6 }
 0x1fc   : > { %1241 = dma.done.wait (%p1119_p7), %s965_s12, 192  }
 0x1fd   : > { %1243 = vsyncadd (%p1119_p7), %s965_s12, 4294967104  ;;  %s18_s20 = sadd.s32 1, %s1266_s20   ;;  %s1659_s15 = smov %s1250_s16 }
 0x1fe   : > { %p15_p9 = scmp.ge.s32.totalorder %s18_s20, 4   ;;  %s1660_s16 = smov %s1254_s17 }
 0x1ff   : > { %s1661_s17 = smov %s1346_s28  ;;  %s1662_s18 = smov %s1262_s19 }
 0x200   : > { %s1663_s19 = smov %s1665_s23  ;;  %17 = sbr.rel (!%p15_p9) target bundleno = 4 (0x4), region = 85 }
 0x205   :  { %983 = vsyncpa [#allocation3], 1 }
 0x206   :  { %985 = vsyncpa [#allocation3 + $0x1], 1 }

</bundles_post_ra>
